<compile_context>
chip_gen: v7x
topology: tpu7x:2x2x1
jax: 0.10.0
libtpu: 0.0.40
codegen_flags: <defaults>
</compile_context>

<pallas_src>
import jax
import jax.numpy as jnp
from jax import lax
from jax.experimental import pallas as pl
from jax.experimental.pallas import tpu as pltpu

FEATURES = ['Age', 'Annual_Income', 'Monthly_Inhand_Salary', 'Num_Bank_Accounts',
            'Outstanding_Debt', 'Credit_Utilization_Ratio', 'Credit_History_Age',
            'Payment_Behaviour']
IN_DIM = len(FEATURES)   # 8
H1 = 16
H2 = 8
OUT_DIM = 3

LANE_CHUNK = 1024        # in-kernel lane chunk (multiple of 128); bounds vreg use
MAX_TILE_B = 32768       # max lanes per grid step (HBM block granularity)
MIN_TILES = 2            # keep >=2 grid steps when possible (v7x has 2 TCs)


def _round_up(x, m):
    return ((x + m - 1) // m) * m


def _mlp_kernel(x_ref, w1_ref, b1_ref, w2_ref, b2_ref, w3_ref, b3_ref, o_ref):
    # x_ref:  (TILE_B, 8)   native batch-major input block
    # wN_ref: (out, in)     PyTorch-native layout, VMEM-resident across steps
    # bN_ref: (out, 1)      broadcasts across the lane (batch) dim
    # o_ref:  (OUT_DIM, TILE_B)  lane-dense, feature-major output block
    w1 = w1_ref[...]; b1 = b1_ref[...]
    w2 = w2_ref[...]; b2 = b2_ref[...]
    w3 = w3_ref[...]; b3 = b3_ref[...]

    tile_b = x_ref.shape[0]
    n_chunks = tile_b // LANE_CHUNK          # tile_b is a multiple of LANE_CHUNK

    def chunk_body(c, carry):
        start = pl.multiple_of(c * LANE_CHUNK, LANE_CHUNK)
        xc = x_ref[pl.ds(start, LANE_CHUNK), :]                  # (CHUNK, 8)

        # h1 = relu(W1 @ xc^T + b1): contract the feature axes of both operands
        # so the batch lands on the 128-wide lane dim (no materialized transpose).
        h1 = lax.dot_general(w1, xc, (((1,), (1,)), ((), ())),
                             preferred_element_type=jnp.float32) + b1
        h1 = jnp.maximum(h1, 0.0)                                 # (16, CHUNK)

        h2 = jnp.dot(w2, h1, preferred_element_type=jnp.float32) + b2
        h2 = jnp.maximum(h2, 0.0)                                 # (8, CHUNK)

        h3 = jnp.dot(w3, h2, preferred_element_type=jnp.float32) + b3

        o_ref[:, pl.ds(start, LANE_CHUNK)] = h3.astype(o_ref.dtype)
        return carry

    lax.fori_loop(0, n_chunks, chunk_body, 0, unroll=True)


def credit_score_forward(x, params, *, feature_major_output=False):
    """x: [B, 8] float32 -> logits [B, 3] (or [3, B] if feature_major_output)."""
    w1, b1, w2, b2, w3, b3 = params
    B = x.shape[0]
    assert x.shape[1] == IN_DIM

    # Balanced batch tiling: at least MIN_TILES steps when B allows (v7x dual-TC),
    # at most MAX_TILE_B lanes per step, tile_b a multiple of LANE_CHUNK.
    n_tiles = max(pl.cdiv(B, MAX_TILE_B), min(MIN_TILES, pl.cdiv(B, LANE_CHUNK)))
    n_tiles = max(n_tiles, 1)
    tile_b = _round_up(pl.cdiv(B, n_tiles), LANE_CHUNK)
    n_tiles = pl.cdiv(B, tile_b)             # re-balance after rounding
    pad_b = n_tiles * tile_b

    x_p = x if pad_b == B else jnp.pad(x, ((0, pad_b - B), (0, 0)))

    def resident(shape):
        # Full-array block, same block index every grid step -> DMA'd once.
        return pl.BlockSpec(shape, lambda i: (0, 0))

    out_fm = pl.pallas_call(
        _mlp_kernel,
        out_shape=jax.ShapeDtypeStruct((OUT_DIM, pad_b), jnp.float32),
        grid=(n_tiles,),
        in_specs=[
            pl.BlockSpec((tile_b, IN_DIM), lambda i: (i, 0)),
            resident(w1.shape), resident(b1.shape),
            resident(w2.shape), resident(b2.shape),
            resident(w3.shape), resident(b3.shape),
        ],
        out_specs=pl.BlockSpec((OUT_DIM, tile_b), lambda i: (0, i)),
        compiler_params=pltpu.CompilerParams(
            dimension_semantics=("parallel",)),
    )(x_p, w1, b1, w2, b2, w3, b3)

    logits_fm = out_fm[:, :B]
    if feature_major_output:
        return logits_fm            # [3, B], skips the final transpose HBM pass
    return logits_fm.T              # [B, 3], matches the nn.Module contract


def init_params(key):
    """Deterministic init mimicking nn.Linear's U(-1/sqrt(fan_in), 1/sqrt(fan_in)).
    Weights are PyTorch-native [out, in]; biases are [out, 1]."""
    keys = jax.random.split(key, 6)

    def linear(kw, kb, fan_in, fan_out):
        bound = 1.0 / jnp.sqrt(jnp.float32(fan_in))
        w = jax.random.uniform(kw, (fan_out, fan_in), jnp.float32, -bound, bound)
        b = jax.random.uniform(kb, (fan_out, 1), jnp.float32, -bound, bound)
        return w, b

    w1, b1 = linear(keys[0], keys[1], IN_DIM, H1)
    w2, b2 = linear(keys[2], keys[3], H1, H2)
    w3, b3 = linear(keys[4], keys[5], H2, OUT_DIM)
    return (w1, b1, w2, b2, w3, b3)


def reference_forward(x, params):
    w1, b1, w2, b2, w3, b3 = params
    h = jnp.maximum(x @ w1.T + b1.T, 0.0)
    h = jnp.maximum(h @ w2.T + b2.T, 0.0)
    return h @ w3.T + b3.T


if __name__ == "__main__":
    key = jax.random.PRNGKey(0)
    k_params, k1, k2, k3 = jax.random.split(key, 4)

    params = init_params(k_params)
    fwd = jax.jit(credit_score_forward)

    # batch=2 (module spec), batch=515 (padding path), batch=3000 (multi-tile +
    # multi-chunk path).
    for name, kx, batch in (("small", k1, 2), ("padded", k2, 515), ("tiled", k3, 3000)):
        x = jax.random.normal(kx, (batch, IN_DIM), dtype=jnp.float32)
        out = jax.block_until_ready(fwd(x, params))
        ref = reference_forward(x, params)
        assert out.shape == (batch, OUT_DIM), f"bad shape ({name})"
        assert jnp.allclose(out, ref, atol=1e-5, rtol=1e-5), f"mismatch ({name})"

    print("KERNEL_OK")
</pallas_src>

<mosaic_0001>
module attributes {stable_mosaic.version = 11 : i64} {
  func.func @_mlp_kernel(%arg0: i32, %arg1: memref<1024x8xf32, #tpu.memory_space<vmem>>, %arg2: memref<16x8xf32, #tpu.memory_space<vmem>>, %arg3: memref<16x1xf32, #tpu.memory_space<vmem>>, %arg4: memref<8x16xf32, #tpu.memory_space<vmem>>, %arg5: memref<8x1xf32, #tpu.memory_space<vmem>>, %arg6: memref<3x8xf32, #tpu.memory_space<vmem>>, %arg7: memref<3x1xf32, #tpu.memory_space<vmem>>, %arg8: memref<3x1024xf32, #tpu.memory_space<vmem>>) attributes {dimension_semantics = [#tpu.dimension_semantics<parallel>], iteration_bounds = array<i64: 1>, scalar_prefetch = 0 : i64, scratch_operands = 0 : i64, tpu.core_type = #tpu.core_type<tc>, window_params = [{transform_indices = @transform_0, window_bounds = array<i64: 1024, 8>}, {pipeline_mode = #tpu.pipeline_mode<synchronous>, transform_indices = @transform_1, window_bounds = array<i64: 16, 8>}, {pipeline_mode = #tpu.pipeline_mode<synchronous>, transform_indices = @transform_2, window_bounds = array<i64: 16, 1>}, {pipeline_mode = #tpu.pipeline_mode<synchronous>, transform_indices = @transform_3, window_bounds = array<i64: 8, 16>}, {pipeline_mode = #tpu.pipeline_mode<synchronous>, transform_indices = @transform_4, window_bounds = array<i64: 8, 1>}, {pipeline_mode = #tpu.pipeline_mode<synchronous>, transform_indices = @transform_5, window_bounds = array<i64: 3, 8>}, {pipeline_mode = #tpu.pipeline_mode<synchronous>, transform_indices = @transform_6, window_bounds = array<i64: 3, 1>}, {transform_indices = @transform_7, window_bounds = array<i64: 3, 1024>}]} {
    %c0 = arith.constant 0 : index
    %c0_0 = arith.constant 0 : index
    %0 = vector.load %arg2[%c0, %c0_0] : memref<16x8xf32, #tpu.memory_space<vmem>>, vector<16x8xf32>
    %c0_1 = arith.constant 0 : index
    %c0_2 = arith.constant 0 : index
    %1 = vector.load %arg3[%c0_1, %c0_2] : memref<16x1xf32, #tpu.memory_space<vmem>>, vector<16x1xf32>
    %c0_3 = arith.constant 0 : index
    %c0_4 = arith.constant 0 : index
    %2 = vector.load %arg4[%c0_3, %c0_4] : memref<8x16xf32, #tpu.memory_space<vmem>>, vector<8x16xf32>
    %c0_5 = arith.constant 0 : index
    %c0_6 = arith.constant 0 : index
    %3 = vector.load %arg5[%c0_5, %c0_6] : memref<8x1xf32, #tpu.memory_space<vmem>>, vector<8x1xf32>
    %c0_7 = arith.constant 0 : index
    %c0_8 = arith.constant 0 : index
    %4 = vector.load %arg6[%c0_7, %c0_8] : memref<3x8xf32, #tpu.memory_space<vmem>>, vector<3x8xf32>
    %c0_9 = arith.constant 0 : index
    %c0_10 = arith.constant 0 : index
    %5 = vector.load %arg7[%c0_9, %c0_10] : memref<3x1xf32, #tpu.memory_space<vmem>>, vector<3x1xf32>
    %c0_i32 = arith.constant 0 : i32
    %c1024_i32 = arith.constant 1024 : i32
    %6 = arith.muli %c0_i32, %c1024_i32 : i32
    %7 = tpu.assume_multiple %6, 1024 : i32
    %8 = arith.index_cast %7 : i32 to index
    %c0_11 = arith.constant 0 : index
    %9 = vector.load %arg1[%8, %c0_11] : memref<1024x8xf32, #tpu.memory_space<vmem>>, vector<1024x8xf32>
    %cst = arith.constant dense<0.000000e+00> : vector<16x1024xf32>
    %10 = tpu.matmul %0, %9, %cst {dimension_numbers = #tpu.dot_dimension_numbers<[1], [1], [0], [0], [0, 0, 1, 0], [], []>} : vector<16x8xf32>, vector<1024x8xf32>, vector<16x1024xf32> -> vector<16x1024xf32>
    %11 = vector.broadcast %1 : vector<16x1xf32> to vector<16x1024xf32>
    %12 = arith.addf %10, %11 : vector<16x1024xf32>
    %cst_12 = arith.constant 0.000000e+00 : f32
    %13 = vector.broadcast %cst_12 : f32 to vector<16x1024xf32>
    %14 = arith.maximumf %12, %13 : vector<16x1024xf32>
    %cst_13 = arith.constant dense<0.000000e+00> : vector<8x1024xf32>
    %15 = tpu.matmul %2, %14, %cst_13 {dimension_numbers = #tpu.dot_dimension_numbers<[1], [0], [0], [1], [0, 0, 1, 1], [], []>} : vector<8x16xf32>, vector<16x1024xf32>, vector<8x1024xf32> -> vector<8x1024xf32>
    %16 = vector.broadcast %3 : vector<8x1xf32> to vector<8x1024xf32>
    %17 = arith.addf %15, %16 : vector<8x1024xf32>
    %cst_14 = arith.constant 0.000000e+00 : f32
    %18 = vector.broadcast %cst_14 : f32 to vector<8x1024xf32>
    %19 = arith.maximumf %17, %18 : vector<8x1024xf32>
    %cst_15 = arith.constant dense<0.000000e+00> : vector<3x1024xf32>
    %20 = tpu.matmul %4, %19, %cst_15 {dimension_numbers = #tpu.dot_dimension_numbers<[1], [0], [0], [1], [0, 0, 1, 1], [], []>} : vector<3x8xf32>, vector<8x1024xf32>, vector<3x1024xf32> -> vector<3x1024xf32>
    %21 = vector.broadcast %5 : vector<3x1xf32> to vector<3x1024xf32>
    %22 = arith.addf %20, %21 : vector<3x1024xf32>
    %c0_16 = arith.constant 0 : index
    %23 = arith.index_cast %7 : i32 to index
    %24 = vector.load %arg8[%c0_16, %23] : memref<3x1024xf32, #tpu.memory_space<vmem>>, vector<3x1024xf32>
    tpu.vector_store %arg8[%c0_16, %23], %22 {strides = array<i32>} : memref<3x1024xf32, #tpu.memory_space<vmem>>, vector<3x1024xf32>,
    %c1_i32 = arith.constant 1 : i32
    return
  }
  func.func @transform_0(%arg0: i32) -> (i32, i32) {
    %c0_i32 = arith.constant 0 : i32
    %c0_i32_0 = arith.constant 0 : i32
    return %arg0, %c0_i32 : i32, i32
  }
  func.func @transform_1(%arg0: i32) -> (i32, i32) {
    %c0_i32 = arith.constant 0 : i32
    %c0_i32_0 = arith.constant 0 : i32
    %c0_i32_1 = arith.constant 0 : i32
    return %c0_i32, %c0_i32_0 : i32, i32
  }
  func.func @transform_2(%arg0: i32) -> (i32, i32) {
    %c0_i32 = arith.constant 0 : i32
    %c0_i32_0 = arith.constant 0 : i32
    %c0_i32_1 = arith.constant 0 : i32
    return %c0_i32, %c0_i32_0 : i32, i32
  }
  func.func @transform_3(%arg0: i32) -> (i32, i32) {
    %c0_i32 = arith.constant 0 : i32
    %c0_i32_0 = arith.constant 0 : i32
    %c0_i32_1 = arith.constant 0 : i32
    return %c0_i32, %c0_i32_0 : i32, i32
  }
  func.func @transform_4(%arg0: i32) -> (i32, i32) {
    %c0_i32 = arith.constant 0 : i32
    %c0_i32_0 = arith.constant 0 : i32
    %c0_i32_1 = arith.constant 0 : i32
    return %c0_i32, %c0_i32_0 : i32, i32
  }
  func.func @transform_5(%arg0: i32) -> (i32, i32) {
    %c0_i32 = arith.constant 0 : i32
    %c0_i32_0 = arith.constant 0 : i32
    %c0_i32_1 = arith.constant 0 : i32
    return %c0_i32, %c0_i32_0 : i32, i32
  }
  func.func @transform_6(%arg0: i32) -> (i32, i32) {
    %c0_i32 = arith.constant 0 : i32
    %c0_i32_0 = arith.constant 0 : i32
    %c0_i32_1 = arith.constant 0 : i32
    return %c0_i32, %c0_i32_0 : i32, i32
  }
  func.func @transform_7(%arg0: i32) -> (i32, i32) {
    %c0_i32 = arith.constant 0 : i32
    %c0_i32_0 = arith.constant 0 : i32
    return %c0_i32, %arg0 : i32, i32
  }
}

</mosaic_0001>

<bundles_post_ra>
// kernel: credit_score_forward.1
= control target key start
LH: loop header
LB: loop body
LE: loop exit
PB: predicated region body
PF: predicated region fallthrough
CT: control target
= control target key end

     0   :  { %vm172_vm0 = vcmask 64512   ;;  %v2004_v29 = vmov 0   ;;  %v2005_v2 = vmov 0.0   ;;  %vm892_vm2 = vcmask 130048   ;;  %s2652_s0 = inlined_call_operand.vmem [shape: f32[1024,8], index: 0, kind: input, shape index: {}]   ;;  %s2653_s1 = inlined_call_operand.vmem [shape: f32[16,8], index: 1, kind: input, shape index: {}]   ;;  %s2654_s2 = inlined_call_operand.vmem [shape: f32[16,1], index: 2, kind: input, shape index: {}]   ;;  %s2655_s4 = inlined_call_operand.vmem [shape: f32[8,1], index: 4, kind: input, shape index: {}]   ;;  %s2656_s6 = inlined_call_operand.vmem [shape: f32[3,1], index: 6, kind: input, shape index: {}]   ;;  %s2657_s3 = inlined_call_operand.vmem [shape: f32[8,16], index: 3, kind: input, shape index: {}]   ;;  %s2658_s5 = inlined_call_operand.vmem [shape: f32[3,8], index: 5, kind: input, shape index: {}]   ;;  %s2659_s7 = inlined_call_operand.vmem [shape: f32[3,1024], index: 7, kind: output, shape index: {}]  }
   0x1   :  { %v50_v0 = vld [vmem:[%s2652_s0 + $0x80] sm:$0xff]  ;;  %v51_v1 = vld [vmem:[%s2652_s0 + $0x88] sm:$0xff]  ;;  %vm2054_vm1 = vmpackc.low %vm172_vm0, %vm172_vm0  ;;  %2002 = vset.pattern.permute.xlu0 %v2004_v29  ;;  %2003 = vset.pattern.permute.xlu1 %v2004_v29 }
   0x2   :  { %v1792_v3 = vpack.c.bf16 %v51_v1, %v50_v0  ;;  %v82_v4 = vld [vmem:[%s2652_s0 + $0x180] sm:$0xff]  ;;  %v83_v5 = vld [vmem:[%s2652_s0 + $0x188] sm:$0xff]  ;;  %v52_v13 = vld [vmem:[%s2652_s0 + $0x90] sm:$0xff] }
   0x3   :  { %v34_v6 = vld [vmem:[%s2652_s0] sm:$0xff]  ;;  %v1840_v7 = vpack.c.bf16 %v83_v5, %v82_v4  ;;  %v35_v8 = vld [vmem:[%s2652_s0 + $0x8] sm:$0xff]  ;;  %v53_v14 = vld [vmem:[%s2652_s0 + $0x98] sm:$0xff] }
   0x4   :  { %v66_v9 = vld [vmem:[%s2652_s0 + $0x100] sm:$0xff]  ;;  %v67_v10 = vld [vmem:[%s2652_s0 + $0x108] sm:$0xff]  ;;  %1794 = vmatprep.subr.msk.bf16.mxu0 %vm2054_vm1, %v1792_v3  ;;  %v1795_v11 = vpack.c.bf16 %v35_v8, %v34_v6  ;;  %v84_v15 = vld [vmem:[%s2652_s0 + $0x190] sm:$0xff]  ;;  %v1798_v16 = vpack.c.bf16 %v53_v14, %v52_v13 }
   0x5   :  { %v1843_v12 = vpack.c.bf16 %v67_v10, %v66_v9  ;;  %1842 = vmatprep.subr.msk.bf16.mxu1 %vm2054_vm1, %v1840_v7  ;;  %v85_v17 = vld [vmem:[%s2652_s0 + $0x198] sm:$0xff]  ;;  %v36_v19 = vld [vmem:[%s2652_s0 + $0x10] sm:$0xff]  ;;  %v54_v23 = vld [vmem:[%s2652_s0 + $0xa0] sm:$0xff] }
   0x6   :  { %1797 = vmatpush3.bf16.xpose.msk.msra.mxu0 %vm2054_vm1, %v1795_v11  ;;  %v1846_v18 = vpack.c.bf16 %v85_v17, %v84_v15  ;;  %v37_v20 = vld [vmem:[%s2652_s0 + $0x18] sm:$0xff]  ;;  %v68_v21 = vld [vmem:[%s2652_s0 + $0x110] sm:$0xff]  ;;  %v55_v24 = vld [vmem:[%s2652_s0 + $0xa8] sm:$0xff] }
   0x7   :  { %1845 = vmatpush3.bf16.xpose.msk.msra.mxu1 %vm2054_vm1, %v1843_v12  ;;  %1800 = vmatprep.subr.msk.bf16.mxu0 %vm2054_vm1, %v1798_v16  ;;  %v69_v22 = vld [vmem:[%s2652_s0 + $0x118] sm:$0xff]  ;;  %v86_v25 = vld [vmem:[%s2652_s0 + $0x1a0] sm:$0xff]  ;;  %v87_v26 = vld [vmem:[%s2652_s0 + $0x1a8] sm:$0xff]  ;;  %v1801_v27 = vpack.c.bf16 %v37_v20, %v36_v19  ;;  %v1804_v30 = vpack.c.bf16 %v55_v24, %v54_v23 }
   0x8   :  { %1848 = vmatprep.subr.msk.bf16.mxu1 %vm2054_vm1, %v1846_v18  ;;  %v1849_v28 = vpack.c.bf16 %v69_v22, %v68_v21  ;;  %v1852_v31 = vpack.c.bf16 %v87_v26, %v86_v25  ;;  %v38_v32 = vld [vmem:[%s2652_s0 + $0x20] sm:$0xff]  ;;  %v39_v33 = vld [vmem:[%s2652_s0 + $0x28] sm:$0xff]  ;;  %v56_v36 = vld [vmem:[%s2652_s0 + $0xb0] sm:$0xff] }
   0x9   :  { %v70_v34 = vld [vmem:[%s2652_s0 + $0x120] sm:$0xff]  ;;  %v71_v35 = vld [vmem:[%s2652_s0 + $0x128] sm:$0xff]  ;;  %v57_v37 = vld [vmem:[%s2652_s0 + $0xb8] sm:$0xff]  ;;  %v1807_v40 = vpack.c.bf16 %v39_v33, %v38_v32 }
   0xa   :  { %v88_v38 = vld [vmem:[%s2652_s0 + $0x1b0] sm:$0xff]  ;;  %v89_v39 = vld [vmem:[%s2652_s0 + $0x1b8] sm:$0xff]  ;;  %v1855_v41 = vpack.c.bf16 %v71_v35, %v70_v34  ;;  %v1810_v42 = vpack.c.bf16 %v57_v37, %v56_v36  ;;  %v2169_v46 = vld [vmem:[%s2653_s1] sm:$0xff] }
   0xb   :  { %v1858_v43 = vpack.c.bf16 %v89_v39, %v88_v38  ;;  %v40_v44 = vld [vmem:[%s2652_s0 + $0x30] sm:$0xff]  ;;  %v41_v45 = vld [vmem:[%s2652_s0 + $0x38] sm:$0xff]  ;;  %v58_v49 = vld [vmem:[%s2652_s0 + $0xc0] sm:$0xff]  ;;  %1680 = vmatprep.mubr.msk.f32.mxu0 %vm172_vm0, %v2169_v46  ;;  %1716 = vmatprep.mubr.msk.f32.mxu1 %vm172_vm0, %v2169_v46 }
   0xc   :  { %v72_v47 = vld [vmem:[%s2652_s0 + $0x130] sm:$0xff]  ;;  %v73_v48 = vld [vmem:[%s2652_s0 + $0x138] sm:$0xff]  ;;  %v59_v50 = vld [vmem:[%s2652_s0 + $0xc8] sm:$0xff]  ;;  %v1813_v53 = vpack.c.bf16 %v41_v45, %v40_v44 }
   0xd   :  { %v90_v51 = vld [vmem:[%s2652_s0 + $0x1c0] sm:$0xff]  ;;  %v91_v52 = vld [vmem:[%s2652_s0 + $0x1c8] sm:$0xff]  ;;  %v1861_v54 = vpack.c.bf16 %v73_v48, %v72_v47  ;;  %v1816_v55 = vpack.c.bf16 %v59_v50, %v58_v49  ;;  %v60_v61 = vld [vmem:[%s2652_s0 + $0xd0] sm:$0xff] }
   0xe   :  { %1803 = vmatpush3.bf16.xpose.msk.msra.mxu0 %vm2054_vm1, %v1801_v27  ;;  %v1864_v56 = vpack.c.bf16 %v91_v52, %v90_v51  ;;  %v42_v57 = vld [vmem:[%s2652_s0 + $0x40] sm:$0xff]  ;;  %v43_v58 = vld [vmem:[%s2652_s0 + $0x48] sm:$0xff]  ;;  %v61_v62 = vld [vmem:[%s2652_s0 + $0xd8] sm:$0xff] }
   0xf   :  { %1851 = vmatpush3.bf16.xpose.msk.msra.mxu1 %vm2054_vm1, %v1849_v28  ;;  %1806 = vmatprep.subr.msk.bf16.mxu0 %vm2054_vm1, %v1804_v30  ;;  %v74_v59 = vld [vmem:[%s2652_s0 + $0x140] sm:$0xff]  ;;  %v75_v60 = vld [vmem:[%s2652_s0 + $0x148] sm:$0xff]  ;;  %v92_v63 = vld [vmem:[%s2652_s0 + $0x1d0] sm:$0xff]  ;;  %v1819_v1 = vpack.c.bf16 %v43_v58, %v42_v57  ;;  %v1822_v4 = vpack.c.bf16 %v61_v62, %v60_v61 }
  0x10   :  { %1854 = vmatprep.subr.msk.bf16.mxu1 %vm2054_vm1, %v1852_v31  ;;  %v93_v0 = vld [vmem:[%s2652_s0 + $0x1d8] sm:$0xff]  ;;  %v1867_v3 = vpack.c.bf16 %v75_v60, %v74_v59  ;;  %v44_v6 = vld [vmem:[%s2652_s0 + $0x50] sm:$0xff]  ;;  %v62_v10 = vld [vmem:[%s2652_s0 + $0xe0] sm:$0xff] }
  0x11   :  { %v1870_v5 = vpack.c.bf16 %v93_v0, %v92_v63  ;;  %v45_v7 = vld [vmem:[%s2652_s0 + $0x58] sm:$0xff]  ;;  %v76_v8 = vld [vmem:[%s2652_s0 + $0x150] sm:$0xff]  ;;  %v63_v11 = vld [vmem:[%s2652_s0 + $0xe8] sm:$0xff] }
  0x12   :  { %v77_v9 = vld [vmem:[%s2652_s0 + $0x158] sm:$0xff]  ;;  %v94_v12 = vld [vmem:[%s2652_s0 + $0x1e0] sm:$0xff]  ;;  %v95_v13 = vld [vmem:[%s2652_s0 + $0x1e8] sm:$0xff]  ;;  %v1825_v14 = vpack.c.bf16 %v45_v7, %v44_v6  ;;  %v1828_v16 = vpack.c.bf16 %v63_v11, %v62_v10 }
  0x13   :  { %v1873_v15 = vpack.c.bf16 %v77_v9, %v76_v8  ;;  %v1876_v17 = vpack.c.bf16 %v95_v13, %v94_v12  ;;  %v28_v18 = vld [vmem:[%s2654_s2] sm:$0xff]  ;;  %v47_v20 = vld [vmem:[%s2652_s0 + $0x68] sm:$0xff]  ;;  %v64_v24 = vld [vmem:[%s2652_s0 + $0xf0] sm:$0xff] }
  0x14   :  { %164 = vperm.xlu0 %2002, %v28_v18   ;;  %v46_v19 = vld [vmem:[%s2652_s0 + $0x60] sm:$0xff]  ;;  %v29_v21 = vld [vmem:[%s2654_s2 + $0x8] sm:$0xff]  ;;  %v65_v25 = vld [vmem:[%s2652_s0 + $0xf8] sm:$0xff] }
  0x15   :  { %v78_v22 = vld [vmem:[%s2652_s0 + $0x160] sm:$0xff]  ;;  %v79_v23 = vld [vmem:[%s2652_s0 + $0x168] sm:$0xff]  ;;  %v96_v26 = vld [vmem:[%s2652_s0 + $0x1f0] sm:$0xff]  ;;  %v1831_v28 = vpack.c.bf16 %v47_v20, %v46_v19  ;;  %v1834_v30 = vpack.c.bf16 %v65_v25, %v64_v24 }
  0x16   :  { %1809 = vmatpush3.bf16.xpose.msk.msra.mxu0 %vm2054_vm1, %v1807_v40  ;;  %v97_v27 = vld [vmem:[%s2652_s0 + $0x1f8] sm:$0xff]  ;;  %v1879_v29 = vpack.c.bf16 %v79_v23, %v78_v22  ;;  %v48_v32 = vld [vmem:[%s2652_s0 + $0x70] sm:$0xff]  ;;  %v114_v36 = vld [vmem:[%s2652_s0 + $0x280] sm:$0xff] }
  0x17   :  { %1857 = vmatpush3.bf16.xpose.msk.msra.mxu1 %vm2054_vm1, %v1855_v41  ;;  %1812 = vmatprep.subr.msk.bf16.mxu0 %vm2054_vm1, %v1810_v42  ;;  %v1882_v31 = vpack.c.bf16 %v97_v27, %v96_v26  ;;  %v49_v33 = vld [vmem:[%s2652_s0 + $0x78] sm:$0xff]  ;;  %v80_v34 = vld [vmem:[%s2652_s0 + $0x170] sm:$0xff]  ;;  %v115_v37 = vld [vmem:[%s2652_s0 + $0x288] sm:$0xff] }
  0x18   :  { %1860 = vmatprep.subr.msk.bf16.mxu1 %vm2054_vm1, %v1858_v43  ;;  %169 = vperm.xlu0 %2002, %v29_v21   ;;  %v81_v35 = vld [vmem:[%s2652_s0 + $0x178] sm:$0xff]  ;;  %v146_v38 = vld [vmem:[%s2652_s0 + $0x380] sm:$0xff]  ;;  %v147_v39 = vld [vmem:[%s2652_s0 + $0x388] sm:$0xff]  ;;  %v1837_v40 = vpack.c.bf16 %v49_v33, %v48_v32  ;;  %v1888_v42 = vpack.c.bf16 %v115_v37, %v114_v36 }
  0x19   :  { %v1885_v41 = vpack.c.bf16 %v81_v35, %v80_v34  ;;  %v1936_v43 = vpack.c.bf16 %v147_v39, %v146_v38  ;;  %v98_v44 = vld [vmem:[%s2652_s0 + $0x200] sm:$0xff]  ;;  %v99_v45 = vld [vmem:[%s2652_s0 + $0x208] sm:$0xff]  ;;  %v116_v49 = vld [vmem:[%s2652_s0 + $0x290] sm:$0xff] }
  0x1a   :  { %v130_v47 = vld [vmem:[%s2652_s0 + $0x300] sm:$0xff]  ;;  %v131_v48 = vld [vmem:[%s2652_s0 + $0x308] sm:$0xff]  ;;  %v117_v50 = vld [vmem:[%s2652_s0 + $0x298] sm:$0xff] }
  0x1b   :  { %v148_v51 = vld [vmem:[%s2652_s0 + $0x390] sm:$0xff]  ;;  %v149_v52 = vld [vmem:[%s2652_s0 + $0x398] sm:$0xff]  ;;  %v118_v62 = vld [vmem:[%s2652_s0 + $0x2a0] sm:$0xff] }
  0x1c   :  { %v1942_v57 = vpack.c.bf16 %v149_v52, %v148_v51  ;;  %v100_v58 = vld [vmem:[%s2652_s0 + $0x210] sm:$0xff]  ;;  %v101_v59 = vld [vmem:[%s2652_s0 + $0x218] sm:$0xff]  ;;  %v119_v63 = vld [vmem:[%s2652_s0 + $0x2a8] sm:$0xff] }
  0x1d   :  { %v132_v60 = vld [vmem:[%s2652_s0 + $0x310] sm:$0xff]  ;;  %v133_v61 = vld [vmem:[%s2652_s0 + $0x318] sm:$0xff]  ;;  %v150_v0 = vld [vmem:[%s2652_s0 + $0x3a0] sm:$0xff] }
  0x1e   :  { %1815 = vmatpush3.bf16.xpose.msk.msra.mxu0 %vm2054_vm1, %v1813_v53  ;;  %v1891_v53 = vpack.c.bf16 %v99_v45, %v98_v44  ;;  %v102_v7 = vld [vmem:[%s2652_s0 + $0x220] sm:$0xff]  ;;  %v103_v8 = vld [vmem:[%s2652_s0 + $0x228] sm:$0xff]  ;;  %v120_v11 = vld [vmem:[%s2652_s0 + $0x2b0] sm:$0xff] }
  0x1f   :  { %1863 = vmatpush3.bf16.xpose.msk.msra.mxu1 %vm2054_vm1, %v1861_v54  ;;  %1818 = vmatprep.subr.msk.bf16.mxu0 %vm2054_vm1, %v1816_v55  ;;  %v1939_v54 = vpack.c.bf16 %v131_v48, %v130_v47  ;;  %v2366_v55 = vld [vmem:[%s2653_s1 + $0x8] sm:$0xff]  ;;  %v134_v9 = vld [vmem:[%s2652_s0 + $0x320] sm:$0xff]  ;;  %v121_v12 = vld [vmem:[%s2652_s0 + $0x2b8] sm:$0xff] }
  0x20   :  { %1866 = vmatprep.subr.msk.bf16.mxu1 %vm2054_vm1, %v1864_v56  ;;  %v1894_v56 = vpack.c.bf16 %v117_v50, %v116_v49  ;;  %v135_v10 = vld [vmem:[%s2652_s0 + $0x328] sm:$0xff]  ;;  %v152_v13 = vld [vmem:[%s2652_s0 + $0x3b0] sm:$0xff]  ;;  %v105_v20 = vld [vmem:[%s2652_s0 + $0x238] sm:$0xff] }
  0x21   :  { %v104_v19 = vld [vmem:[%s2652_s0 + $0x230] sm:$0xff]  ;;  %v137_v22 = vld [vmem:[%s2652_s0 + $0x338] sm:$0xff]  ;;  %v122_v23 = vld [vmem:[%s2652_s0 + $0x2c0] sm:$0xff] }
  0x22   :  { %v136_v21 = vld [vmem:[%s2652_s0 + $0x330] sm:$0xff]  ;;  %v123_v24 = vld [vmem:[%s2652_s0 + $0x2c8] sm:$0xff]  ;;  %v154_v25 = vld [vmem:[%s2652_s0 + $0x3c0] sm:$0xff]  ;;  %v1909_v27 = vpack.c.bf16 %v105_v20, %v104_v19 }
  0x23   :  { %v155_v26 = vld [vmem:[%s2652_s0 + $0x3c8] sm:$0xff]  ;;  %v138_v33 = vld [vmem:[%s2652_s0 + $0x340] sm:$0xff]  ;;  %v124_v35 = vld [vmem:[%s2652_s0 + $0x2d0] sm:$0xff] }
  0x24   :  { %v107_v32 = vld [vmem:[%s2652_s0 + $0x248] sm:$0xff]  ;;  %v125_v36 = vld [vmem:[%s2652_s0 + $0x2d8] sm:$0xff]  ;;  %v156_v37 = vld [vmem:[%s2652_s0 + $0x3d0] sm:$0xff] }
  0x25   :  { %v139_v34 = vld [vmem:[%s2652_s0 + $0x348] sm:$0xff]  ;;  %v157_v38 = vld [vmem:[%s2652_s0 + $0x3d8] sm:$0xff]  ;;  %v140_v45 = vld [vmem:[%s2652_s0 + $0x350] sm:$0xff] }
  0x26   :  { %1821 = vmatpush3.bf16.xpose.msk.msra.mxu0 %vm2054_vm1, %v1819_v1  ;;  %v151_v1 = vld [vmem:[%s2652_s0 + $0x3a8] sm:$0xff]  ;;  %v109_v44 = vld [vmem:[%s2652_s0 + $0x258] sm:$0xff]  ;;  %v126_v48 = vld [vmem:[%s2652_s0 + $0x2e0] sm:$0xff] }
  0x27   :  { %1869 = vmatpush3.bf16.xpose.msk.msra.mxu1 %vm2054_vm1, %v1867_v3  ;;  %1824 = vmatprep.subr.msk.bf16.mxu0 %vm2054_vm1, %v1822_v4  ;;  %v1897_v3 = vpack.c.bf16 %v101_v59, %v100_v58  ;;  %v1945_v4 = vpack.c.bf16 %v133_v61, %v132_v60  ;;  %v1948_v6 = vpack.c.bf16 %v151_v1, %v150_v0  ;;  %v141_v47 = vld [vmem:[%s2652_s0 + $0x358] sm:$0xff]  ;;  %v127_v49 = vld [vmem:[%s2652_s0 + $0x2e8] sm:$0xff]  ;;  %v158_v50 = vld [vmem:[%s2652_s0 + $0x3e0] sm:$0xff] }
  0x28   :  { %1872 = vmatprep.subr.msk.bf16.mxu1 %vm2054_vm1, %v1870_v5  ;;  %v1900_v5 = vpack.c.bf16 %v119_v63, %v118_v62  ;;  %v159_v51 = vld [vmem:[%s2652_s0 + $0x3e8] sm:$0xff]  ;;  %v142_v59 = vld [vmem:[%s2652_s0 + $0x360] sm:$0xff]  ;;  %v128_v61 = vld [vmem:[%s2652_s0 + $0x2f0] sm:$0xff] }
  0x29   :  { %v111_v58 = vld [vmem:[%s2652_s0 + $0x268] sm:$0xff]  ;;  %v129_v62 = vld [vmem:[%s2652_s0 + $0x2f8] sm:$0xff]  ;;  %v160_v63 = vld [vmem:[%s2652_s0 + $0x3f0] sm:$0xff] }
  0x2a   :  { %v143_v60 = vld [vmem:[%s2652_s0 + $0x368] sm:$0xff]  ;;  %v161_v0 = vld [vmem:[%s2652_s0 + $0x3f8] sm:$0xff] }
  0x2e   :  { %1827 = vmatpush3.bf16.xpose.msk.msra.mxu0 %vm2054_vm1, %v1825_v14  ;;  %v153_v14 = vld [vmem:[%s2652_s0 + $0x3b8] sm:$0xff] }
  0x2f   :  { %1875 = vmatpush3.bf16.xpose.msk.msra.mxu1 %vm2054_vm1, %v1873_v15  ;;  %1830 = vmatprep.subr.msk.bf16.mxu0 %vm2054_vm1, %v1828_v16  ;;  %v1903_v15 = vpack.c.bf16 %v103_v8, %v102_v7  ;;  %v1951_v16 = vpack.c.bf16 %v135_v10, %v134_v9  ;;  %v1954_v18 = vpack.c.bf16 %v153_v14, %v152_v13  ;;  %v113_v7 = vld [vmem:[%s2652_s0 + $0x278] sm:$0xff]  ;;  %v144_v8 = vld [vmem:[%s2652_s0 + $0x370] sm:$0xff] }
  0x30   :  { %1878 = vmatprep.subr.msk.bf16.mxu1 %vm2054_vm1, %v1876_v17  ;;  %v1906_v17 = vpack.c.bf16 %v121_v12, %v120_v11  ;;  %v145_v9 = vld [vmem:[%s2652_s0 + $0x378] sm:$0xff]  ;;  %v33_v12 = vld [vmem:[%s2656_s6] sm:$0x7] }
  0x31   :  { %v1981_v11 = vpack.c.bf16 %v145_v9, %v144_v8 }
  0x36   :  { %1833 = vmatpush3.bf16.xpose.msk.msra.mxu0 %vm2054_vm1, %v1831_v28  ;;  %v1957_v28 = vpack.c.bf16 %v137_v22, %v136_v21 }
  0x37   :  { %1881 = vmatpush3.bf16.xpose.msk.msra.mxu1 %vm2054_vm1, %v1879_v29  ;;  %1836 = vmatprep.subr.msk.bf16.mxu0 %vm2054_vm1, %v1834_v30  ;;  %v1912_v29 = vpack.c.bf16 %v123_v24, %v122_v23  ;;  %v1960_v30 = vpack.c.bf16 %v155_v26, %v154_v25 }
  0x38   :  { %1884 = vmatprep.subr.msk.bf16.mxu1 %vm2054_vm1, %v1882_v31  ;;  %v106_v31 = vld [vmem:[%s2652_s0 + $0x240] sm:$0xff] }
  0x39   :  { %v1915_v39 = vpack.c.bf16 %v107_v32, %v106_v31 }
  0x3e   :  { %1839 = vmatpush3.bf16.xpose.msk.msra.mxu0 %vm2054_vm1, %v1837_v40  ;;  %v1963_v40 = vpack.c.bf16 %v139_v34, %v138_v33 }
  0x3f   :  { %1887 = vmatpush3.bf16.xpose.msk.msra.mxu1 %vm2054_vm1, %v1885_v41  ;;  %1890 = vmatprep.subr.msk.bf16.mxu0 %vm2054_vm1, %v1888_v42  ;;  %v1918_v41 = vpack.c.bf16 %v125_v36, %v124_v35  ;;  %v1966_v42 = vpack.c.bf16 %v157_v38, %v156_v37 }
  0x40   :  { %1938 = vmatprep.subr.msk.bf16.mxu1 %vm2054_vm1, %v1936_v43  ;;  %v108_v43 = vld [vmem:[%s2652_s0 + $0x250] sm:$0xff] }
  0x41   :  { %v1921_v52 = vpack.c.bf16 %v109_v44, %v108_v43 }
  0x45   :  { %1681 = vmatmul.mubr.msk.f32.vlgmr.msra.gmra.mrb[0].mxu0 %vm172_vm0, %v2169_v46 }
  0x46   :  { %1717 = vmatmul.mubr.msk.f32.vlgmr.msra.gmra.mrb[0].mxu1 %vm172_vm0, %v2169_v46  ;;  %1893 = vmatpush3.bf16.xpose.msk.msra.mxu0 %vm2054_vm1, %v1891_v53  ;;  %v1969_v53 = vpack.c.bf16 %v141_v47, %v140_v45 }
  0x47   :  { %1941 = vmatpush3.bf16.xpose.msk.msra.mxu1 %vm2054_vm1, %v1939_v54  ;;  %1682 = vmatprep.mubr.msk.f32.mxu0 %vm172_vm0, %v2366_v55  ;;  %v1924_v54 = vpack.c.bf16 %v127_v49, %v126_v48 }
  0x48   :  { %1718 = vmatprep.mubr.msk.f32.mxu1 %vm172_vm0, %v2366_v55  ;;  %1896 = vmatprep.subr.msk.bf16.mxu0 %vm2054_vm1, %v1894_v56  ;;  %v1972_v56 = vpack.c.bf16 %v159_v51, %v158_v50 }
  0x49   :  { %1944 = vmatprep.subr.msk.bf16.mxu1 %vm2054_vm1, %v1942_v57  ;;  %1683 = vmatmul.mubr.msk.f32.gmra.mrb[2].mxu0 %vm172_vm0, %v2366_v55  ;;  %v110_v57 = vld [vmem:[%s2652_s0 + $0x260] sm:$0xff] }
  0x4a   :  { %1719 = vmatmul.mubr.msk.f32.gmra.mrb[2].mxu1 %vm172_vm0, %v2366_v55  ;;  %1752 = vmatprep.mubr.msk.f32.mxu0 %vm172_vm0, %v2169_v46  ;;  %v1927_v1 = vpack.c.bf16 %v111_v58, %v110_v57 }
  0x4b   :  { %1788 = vmatprep.mubr.msk.f32.mxu1 %vm172_vm0, %v2169_v46 }
  0x4e   :  { %1899 = vmatpush3.bf16.xpose.msk.msra.mxu0 %vm2054_vm1, %v1897_v3  ;;  %v1975_v3 = vpack.c.bf16 %v143_v60, %v142_v59 }
  0x4f   :  { %1947 = vmatpush3.bf16.xpose.msk.msra.mxu1 %vm2054_vm1, %v1945_v4  ;;  %1902 = vmatprep.subr.msk.bf16.mxu0 %vm2054_vm1, %v1900_v5  ;;  %v1930_v4 = vpack.c.bf16 %v129_v62, %v128_v61  ;;  %v1978_v5 = vpack.c.bf16 %v161_v0, %v160_v63 }
  0x50   :  { %1950 = vmatprep.subr.msk.bf16.mxu1 %vm2054_vm1, %v1948_v6  ;;  %v112_v6 = vld [vmem:[%s2652_s0 + $0x270] sm:$0xff] }
  0x51   :  { %v1933_v10 = vpack.c.bf16 %v113_v7, %v112_v6 }
  0x56   :  { %1905 = vmatpush3.bf16.xpose.msk.msra.mxu0 %vm2054_vm1, %v1903_v15 }
  0x57   :  { %1953 = vmatpush3.bf16.xpose.msk.msra.mxu1 %vm2054_vm1, %v1951_v16  ;;  %1908 = vmatprep.subr.msk.bf16.mxu0 %vm2054_vm1, %v1906_v17 }
  0x58   :  { %1956 = vmatprep.subr.msk.bf16.mxu1 %vm2054_vm1, %v1954_v18 }
  0x5e   :  { %1911 = vmatpush3.bf16.xpose.msk.msra.mxu0 %vm2054_vm1, %v1909_v27 }
  0x5f   :  { %1959 = vmatpush3.bf16.xpose.msk.msra.mxu1 %vm2054_vm1, %v1957_v28  ;;  %1914 = vmatprep.subr.msk.bf16.mxu0 %vm2054_vm1, %v1912_v29 }
  0x60   :  { %1962 = vmatprep.subr.msk.bf16.mxu1 %vm2054_vm1, %v1960_v30 }
  0x66   :  { %1917 = vmatpush3.bf16.xpose.msk.msra.mxu0 %vm2054_vm1, %v1915_v39 }
  0x67   :  { %1965 = vmatpush3.bf16.xpose.msk.msra.mxu1 %vm2054_vm1, %v1963_v40  ;;  %1920 = vmatprep.subr.msk.bf16.mxu0 %vm2054_vm1, %v1918_v41 }
  0x68   :  { %1968 = vmatprep.subr.msk.bf16.mxu1 %vm2054_vm1, %v1966_v42  ;;  %v30_v42 = vld [vmem:[%s2657_s3] sm:$0xff] }
  0x6e   :  { %1923 = vmatpush3.bf16.xpose.msk.msra.mxu0 %vm2054_vm1, %v1921_v52 }
  0x6f   :  { %1971 = vmatpush3.bf16.xpose.msk.msra.mxu1 %vm2054_vm1, %v1969_v53  ;;  %1926 = vmatprep.subr.msk.bf16.mxu0 %vm2054_vm1, %v1924_v54 }
  0x70   :  { %1974 = vmatprep.subr.msk.bf16.mxu1 %vm2054_vm1, %v1972_v56 }
  0x76   :  { %1929 = vmatpush3.bf16.xpose.msk.msra.mxu0 %vm2054_vm1, %v1927_v1 }
  0x77   :  { %1977 = vmatpush3.bf16.xpose.msk.msra.mxu1 %vm2054_vm1, %v1975_v3  ;;  %1932 = vmatprep.subr.msk.bf16.mxu0 %vm2054_vm1, %v1930_v4 }
  0x78   :  { %1980 = vmatprep.subr.msk.bf16.mxu1 %vm2054_vm1, %v1978_v5 }
  0x7e   :  { %1935 = vmatpush3.bf16.xpose.msk.msra.mxu0 %vm2054_vm1, %v1933_v10 }
  0x7f   :  { %1983 = vmatpush3.bf16.xpose.msk.msra.mxu1 %vm2054_vm1, %v1981_v11 }
  0x85   :  { %1753 = vmatmul.mubr.msk.f32.vlgmr.msra.gmra.mrb[4].mxu0 %vm172_vm0, %v2169_v46 }
  0x86   :  { %1789 = vmatmul.mubr.msk.f32.vlgmr.msra.gmra.mrb[4].mxu1 %vm172_vm0, %v2169_v46  ;;  %1754 = vmatprep.mubr.msk.f32.mxu0 %vm172_vm0, %v2366_v55  ;;  %v31_v46 = vld [vmem:[%s2655_s4] sm:$0xff] }
  0x87   :  { %1790 = vmatprep.mubr.msk.f32.mxu1 %vm172_vm0, %v2366_v55  ;;  %889 = vperm.xlu1 %2003, %v31_v46  }
  0x89   :  { %1755 = vmatmul.mubr.msk.f32.gmra.mrb[6].mxu0 %vm172_vm0, %v2366_v55 }
  0x8a   :  { %1791 = vmatmul.mubr.msk.f32.gmra.mrb[6].mxu1 %vm172_vm0, %v2366_v55  ;;  %960 = vmatprep.mubr.f32.mxu0 %v2005_v2 }
  0x8b   :  { %1031 = vmatprep.mubr.f32.mxu1 %v2005_v2  ;;  %1190 = vperm.xlu1 %2003, %v33_v12  }
  0x93   :  { %v165_v13 = vpop.permute.xlu0 %164 }
  0x97   :  { %v170_v17 = vpop.permute.xlu0 %169 }
 0x106   :  { %v890_v10 = vpop.permute.xlu1 %889 }
 0x118   :  { %v629_v14 = vpop.f32.mrb[0].mxu0 }
 0x119   :  { %v706_v15 = vpop.f32.mrb[0].mxu1  ;;  %v631_v16 = vpop.f32.mrb[1].mxu0  ;;  %v630_v18 = vadd.f32 %v629_v14, %v165_v13 }
 0x11a   :  { %v708_v55 = vpop.f32.mrb[1].mxu1  ;;  %v707_v19 = vadd.f32 %v706_v15, %v165_v13  ;;  %v632_v20 = vadd.f32 %v631_v16, %v165_v13 }
 0x11b   :  { %v709_v21 = vadd.f32 %v708_v55, %v165_v13  ;;  %v871_v30 = vmax.f32 %v630_v18, 0.0 }
 0x11c   :  { %v635_v22 = vpop.f32.mrb[2].mxu0  ;;  %v873_v31 = vmax.f32 %v707_v19, 0.0  ;;  %v872_v34 = vmax.f32 %v632_v20, 0.0 }
 0x11d   :  { %v712_v23 = vpop.f32.mrb[2].mxu1  ;;  %v636_v24 = vadd.f32 %v635_v22, %v170_v17  ;;  %v637_v26 = vpop.f32.mrb[3].mxu0  ;;  %v874_v35 = vmax.f32 %v709_v21, 0.0  ;;  %v32_v21 = vld [vmem:[%s2658_s5] sm:$0x7] }
 0x11e   :  { %v713_v25 = vadd.f32 %v712_v23, %v170_v17  ;;  %v714_v27 = vpop.f32.mrb[3].mxu1  ;;  %v638_v28 = vadd.f32 %v637_v26, %v170_v17 }
 0x11f   :  { %v715_v29 = vadd.f32 %v714_v27, %v170_v17  ;;  %v879_v32 = vmax.f32 %v636_v24, 0.0 }
 0x120   :  { %v881_v33 = vmax.f32 %v713_v25, 0.0  ;;  %v880_v36 = vmax.f32 %v638_v28, 0.0 }
 0x121   :  { %v882_v37 = vmax.f32 %v715_v29, 0.0  ;;  %v1986_v38 = vpack.c.bf16 %v879_v32, %v871_v30 }
 0x122   :  { %v1990_v39 = vpack.c.bf16 %v881_v33, %v873_v31  ;;  %v1984_v40 = vpack.c.bf16 %v880_v36, %v872_v34 }
 0x123   :  { %v1988_v41 = vpack.c.bf16 %v882_v37, %v874_v35 }
 0x124   :  { %1985 = vmatprep.subr.bf16.mxu0 %v1984_v40 }
 0x125   :  { %1989 = vmatprep.subr.bf16.mxu1 %v1988_v41  ;;  %1987 = vmatpush1.bf16.msra.mxu0 %v1986_v38 }
 0x126   :  { %1991 = vmatpush1.bf16.msra.mxu1 %v1990_v39 }
 0x128   :  { %1640 = vmatmul.mubr.msk.f32.vlgmr.msra.gmra.mrb[8].mxu0 %vm892_vm2, %v30_v42 }
 0x129   :  { %1641 = vmatmul.mubr.msk.f32.vlgmr.msra.gmra.mrb[8].mxu1 %vm892_vm2, %v30_v42  ;;  %1102 = vmatprep.mubr.f32.mxu0 %v2005_v2 }
 0x12a   :  { %1173 = vmatprep.mubr.f32.mxu1 %v2005_v2 }
 0x158   :  { %v783_v43 = vpop.f32.mrb[4].mxu0 }
 0x159   :  { %v860_v44 = vpop.f32.mrb[4].mxu1  ;;  %v785_v45 = vpop.f32.mrb[5].mxu0  ;;  %v784_v48 = vadd.f32 %v783_v43, %v165_v13 }
 0x15a   :  { %v862_v47 = vpop.f32.mrb[5].mxu1  ;;  %v861_v49 = vadd.f32 %v860_v44, %v165_v13  ;;  %v786_v50 = vadd.f32 %v785_v45, %v165_v13 }
 0x15b   :  { %v863_v51 = vadd.f32 %v862_v47, %v165_v13  ;;  %v875_v61 = vmax.f32 %v784_v48, 0.0 }
 0x15c   :  { %v789_v52 = vpop.f32.mrb[6].mxu0  ;;  %v877_v62 = vmax.f32 %v861_v49, 0.0  ;;  %v876_v1 = vmax.f32 %v786_v50, 0.0 }
 0x15d   :  { %v866_v53 = vpop.f32.mrb[6].mxu1  ;;  %v790_v54 = vadd.f32 %v789_v52, %v170_v17  ;;  %v791_v57 = vpop.f32.mrb[7].mxu0  ;;  %v878_v3 = vmax.f32 %v863_v51, 0.0 }
 0x15e   :  { %v867_v56 = vadd.f32 %v866_v53, %v170_v17  ;;  %v868_v58 = vpop.f32.mrb[7].mxu1  ;;  %v792_v59 = vadd.f32 %v791_v57, %v170_v17 }
 0x15f   :  { %v869_v60 = vadd.f32 %v868_v58, %v170_v17  ;;  %v883_v63 = vmax.f32 %v790_v54, 0.0 }
 0x160   :  { %v885_v0 = vmax.f32 %v867_v56, 0.0  ;;  %v884_v4 = vmax.f32 %v792_v59, 0.0 }
 0x161   :  { %v886_v5 = vmax.f32 %v869_v60, 0.0  ;;  %v1994_v6 = vpack.c.bf16 %v883_v63, %v875_v61 }
 0x162   :  { %v1998_v7 = vpack.c.bf16 %v885_v0, %v877_v62  ;;  %v1992_v8 = vpack.c.bf16 %v884_v4, %v876_v1 }
 0x163   :  { %v1996_v9 = vpack.c.bf16 %v886_v5, %v878_v3 }
 0x164   :  { %1993 = vmatprep.subr.bf16.mxu0 %v1992_v8 }
 0x165   :  { %1997 = vmatprep.subr.bf16.mxu1 %v1996_v9  ;;  %1995 = vmatpush1.bf16.msra.mxu0 %v1994_v6 }
 0x166   :  { %1999 = vmatpush1.bf16.msra.mxu1 %v1998_v7 }
 0x168   :  { %1642 = vmatmul.mubr.msk.f32.vlgmr.msra.gmra.mrb[10].mxu0 %vm892_vm2, %v30_v42 }
 0x169   :  { %1643 = vmatmul.mubr.msk.f32.vlgmr.msra.gmra.mrb[10].mxu1 %vm892_vm2, %v30_v42  ;;  %1260 = vmatprep.mubr.f32.mxu0 %v2005_v2 }
 0x16a   :  { %1331 = vmatprep.mubr.f32.mxu1 %v2005_v2 }
 0x1fb   :  { %v962_v11 = vpop.f32.mrb[8].mxu0 }
 0x1fc   :  { %v1033_v46 = vpop.f32.mrb[8].mxu1  ;;  %v964_v12 = vpop.f32.mrb[9].mxu0  ;;  %v963_v14 = vadd.f32 %v962_v11, %v890_v10 }
 0x1fd   :  { %v1035_v13 = vpop.f32.mrb[9].mxu1  ;;  %v1034_v15 = vadd.f32 %v1033_v46, %v890_v10  ;;  %v965_v16 = vadd.f32 %v964_v12, %v890_v10 }
 0x1fe   :  { %v1036_v55 = vadd.f32 %v1035_v13, %v890_v10  ;;  %v1180_v17 = vmax.f32 %v963_v14, 0.0 }
 0x1ff   :  { %v1182_v18 = vmax.f32 %v1034_v15, 0.0  ;;  %v1181_v19 = vmax.f32 %v965_v16, 0.0 }
 0x200   :  { %v1183_v20 = vmax.f32 %v1036_v55, 0.0 }
 0x201   :  { %1196 = vmatprep.subr.mxu0 %v1181_v19 }
 0x202   :  { %1267 = vmatprep.subr.mxu1 %v1183_v20  ;;  %1197 = vmatpush1.msra.mxu0 %v1180_v17 }
 0x203   :  { %1268 = vmatpush1.msra.mxu1 %v1182_v18  ;;  %1644 = vmatmul.mubr.msk.f32.vlgmr.msra.gmra.mrb[12].mxu0 %vm172_vm0, %v32_v21 }
 0x204   :  { %1645 = vmatmul.mubr.msk.f32.vlgmr.msra.gmra.mrb[12].mxu1 %vm172_vm0, %v32_v21  ;;  %1402 = vmatprep.mubr.f32.mxu0 %v2005_v2 }
 0x205   :  { %1473 = vmatprep.mubr.f32.mxu1 %v2005_v2  ;;  %v1191_v2 = vpop.permute.xlu1 %1190 }
 0x23b   :  { %v1104_v22 = vpop.f32.mrb[10].mxu0 }
 0x23c   :  { %v1175_v23 = vpop.f32.mrb[10].mxu1  ;;  %v1105_v24 = vadd.f32 %v1104_v22, %v890_v10  ;;  %v1106_v26 = vpop.f32.mrb[11].mxu0 }
 0x23d   :  { %v1176_v25 = vadd.f32 %v1175_v23, %v890_v10  ;;  %v1177_v27 = vpop.f32.mrb[11].mxu1  ;;  %v1107_v28 = vadd.f32 %v1106_v26, %v890_v10 }
 0x23e   :  { %v1178_v29 = vadd.f32 %v1177_v27, %v890_v10  ;;  %v1184_v32 = vmax.f32 %v1105_v24, 0.0 }
 0x23f   :  { %v1185_v30 = vmax.f32 %v1107_v28, 0.0  ;;  %v1186_v33 = vmax.f32 %v1176_v25, 0.0 }
 0x240   :  { %v1187_v31 = vmax.f32 %v1178_v29, 0.0 }
 0x241   :  { %1338 = vmatprep.subr.mxu0 %v1185_v30 }
 0x242   :  { %1409 = vmatprep.subr.mxu1 %v1187_v31  ;;  %1339 = vmatpush1.msra.mxu0 %v1184_v32 }
 0x243   :  { %1410 = vmatpush1.msra.mxu1 %v1186_v33  ;;  %1646 = vmatmul.mubr.msk.f32.vlgmr.msra.gmra.mrb[14].mxu0 %vm172_vm0, %v32_v21 }
 0x244   :  { %1647 = vmatmul.mubr.msk.f32.vlgmr.msra.gmra.mrb[14].mxu1 %vm172_vm0, %v32_v21 }
 0x2d6   :  { %v1262_v34 = vpop.f32.mrb[12].mxu0 }
 0x2d7   :  { %v1333_v35 = vpop.f32.mrb[12].mxu1  ;;  %v1263_v36 = vadd.f32 %v1262_v34, %v1191_v2  ;;  %v1264_v38 = vpop.f32.mrb[13].mxu0 }
 0x2d8   :  { %v1334_v37 = vadd.f32 %v1333_v35, %v1191_v2  ;;  %v1335_v39 = vpop.f32.mrb[13].mxu1  ;;  %v1265_v40 = vadd.f32 %v1264_v38, %v1191_v2 }
 0x2d9   :  { %v1336_v41 = vadd.f32 %v1335_v39, %v1191_v2 }
 0x2da   :  { %v1488_v42 = vcombine.low %v1263_v36, %v1265_v40 }
 0x2db   :  { %v1489_v43 = vcombine.low %v1334_v37, %v1336_v41 }
 0x2dc   :  { %1496 = vst [vmem:[%s2659_s7] sm:$0x77] %v1488_v42 }
 0x2dd   :  { %1497 = vst [vmem:[%s2659_s7 + $0x8] sm:$0x77] %v1489_v43 }
 0x316   :  { %v1404_v44 = vpop.f32.mrb[14].mxu0 }
 0x317   :  { %v1475_v45 = vpop.f32.mrb[14].mxu1  ;;  %v1405_v47 = vadd.f32 %v1404_v44, %v1191_v2  ;;  %v1406_v49 = vpop.f32.mrb[15].mxu0 }
 0x318   :  { %v1476_v48 = vadd.f32 %v1475_v45, %v1191_v2  ;;  %v1477_v50 = vpop.f32.mrb[15].mxu1  ;;  %v1407_v51 = vadd.f32 %v1406_v49, %v1191_v2 }
 0x319   :  { %v1478_v52 = vadd.f32 %v1477_v50, %v1191_v2 }
 0x31a   :  { %v1490_v53 = vcombine.low %v1405_v47, %v1407_v51 }
 0x31b   :  { %v1491_v54 = vcombine.low %v1476_v48, %v1478_v52 }
 0x31c   :  { %1498 = vst [vmem:[%s2659_s7 + $0x10] sm:$0x77] %v1490_v53 }
 0x31d   :  { %1499 = vst [vmem:[%s2659_s7 + $0x18] sm:$0x77] %v1491_v54 }

</bundles_post_ra>
